<compile_context>
chip_gen: v7x
topology: tpu7x:2x2x1
jax: 0.10.0
libtpu: 0.0.40
codegen_flags: <defaults>
</compile_context>

<pallas_src>
import functools

import jax
import jax.numpy as jnp
from jax.experimental import pallas as pl
from jax.experimental.pallas import tpu as pltpu


def _round_up(n: int, m: int) -> int:
    return (n + m - 1) // m * m


def _icnn_kernel(x_ref, wall_ref, ball_ref, w2c_ref, w3c_ref, wlcr_ref,
                 o_ref, *, hp, tile_b):
    """One batch tile of the ICNN forward.

    x_ref    : (tile_b, D)
    wall_ref : (D, 3*hp + 128)  = [W1n | W2n | W3n | Wln(bcast 128)]  zero-padded
    ball_ref : (1, 3*hp + 128)  = [b1  | b2  | b3  | bl (bcast 128)]  zero-padded
    w2c_ref  : (hp, hp)   zero-padded convex weight
    w3c_ref  : (hp, hp)   zero-padded convex weight
    wlcr_ref : (1, hp)    last_convex weight as a row (zero-padded)
    o_ref    : (1, tile_b//128, 128)  packed per-row scalars (lane-dense)
    """
    g = tile_b // 128
    x = x_ref[...]
    cdt = wall_ref.dtype  # compute dtype for MXU operands (f32 or bf16)

    # Fused x-projection for the three normal layers + the 1-wide last_linear.
    xp = jnp.dot(x, wall_ref[...],
                 preferred_element_type=jnp.float32) + ball_ref[...]
    p1 = xp[:, 0 * hp:1 * hp]            # x @ W1n + b1
    p2 = xp[:, 1 * hp:2 * hp]            # x @ W2n + b2
    p3 = xp[:, 2 * hp:3 * hp]            # x @ W3n + b3
    p4 = xp[:, 3 * hp:3 * hp + 128]      # x @ Wln + bl (same value in 128 lanes)

    # layer 1: relu(.)^2 (f32)
    h1 = jnp.maximum(p1, 0.0)
    h1 = h1 * h1

    # layer 2 / 3: relu(convex(h) + normal(x))
    h2 = jnp.dot(h1.astype(cdt), w2c_ref[...],
                 preferred_element_type=jnp.float32) + p2
    h2 = jnp.maximum(h2, 0.0)
    h3 = jnp.dot(h2.astype(cdt), w3c_ref[...],
                 preferred_element_type=jnp.float32) + p3
    h3 = jnp.maximum(h3, 0.0)

    # last layer: N=1 convex matmul on the VPU/XLU (mul + lane reduce);
    # last_linear is already folded into p4.
    conv = jnp.sum(h3 * wlcr_ref[...], axis=-1, keepdims=True)   # (tile_b, 1)
    sq = conv + p4                                               # (tile_b, 128)
    sq = sq * sq                                                 # lanes all equal

    # Pack per-row scalars lane-dense: output row r holds tile rows
    # r*128 .. r*128+127.  Because every lane of `sq` carries the row scalar,
    # the diagonal of each 128x128 chunk (VPU multiply with identity + sublane
    # reduce, both cheap and always-lowerable) gives the packed row directly.
    row_id = jax.lax.broadcasted_iota(jnp.int32, (128, 128), 0)
    col_id = jax.lax.broadcasted_iota(jnp.int32, (128, 128), 1)
    eye = (row_id == col_id).astype(jnp.float32)
    rows = []
    for r in range(g):
        blk = sq[r * 128:(r + 1) * 128, :]                       # (128, 128)
        rows.append(jnp.sum(blk * eye, axis=0, keepdims=True))   # (1, 128)
    packed = jnp.concatenate(rows, axis=0)                       # (g, 128)
    o_ref[...] = packed.reshape(1, g, 128)


@functools.partial(jax.jit, static_argnames=("dtype",))
def icnn_forward(x, params, *, dtype=jnp.float32):
    """x: (B, D) float32; params as produced by init_params (weights (in, out))."""
    B, D = x.shape
    H = params["w2c"].shape[0]
    Hp = _round_up(H, 128)
    itemsize = jnp.dtype(dtype).itemsize
    wcols = 3 * Hp + 128

    # ---- pack / zero-pad weights (padded lanes stay exactly 0) -------------
    def pad_w(w):   # (D, H) -> (D, Hp)
        return jnp.pad(w, ((0, 0), (0, Hp - H)))

    def pad_b(b):   # (1, H) -> (1, Hp)
        return jnp.pad(b, ((0, 0), (0, Hp - H)))

    w_all = jnp.concatenate(
        [pad_w(params["w1n"]), pad_w(params["w2n"]), pad_w(params["w3n"]),
         jnp.broadcast_to(params["wln"], (D, 128))], axis=1).astype(dtype)
    b_all = jnp.concatenate(
        [pad_b(params["b1"]), pad_b(params["b2"]), pad_b(params["b3"]),
         jnp.broadcast_to(params["bl"], (1, 128))], axis=1).astype(jnp.float32)
    w2c = jnp.pad(params["w2c"], ((0, Hp - H), (0, Hp - H))).astype(dtype)
    w3c = jnp.pad(params["w3c"], ((0, Hp - H), (0, Hp - H))).astype(dtype)
    wlc_row = jnp.pad(params["wlc"].T, ((0, 0), (0, Hp - H))).astype(jnp.float32)

    # ---- batch tiling: 128-row groups, g groups per tile --------------------
    b128 = _round_up(max(B, 1), 128)
    m = b128 // 128
    # rough per-group f32 intermediate footprint -> cap tile size by VMEM budget
    tmp_per_group = 128 * (wcols + 4 * Hp) * 4
    g_budget = max(1, int((24 << 20) // tmp_per_group))
    max_g = min(m, 8, g_budget)                       # <= 1024 rows per tile
    if m >= 2:
        max_g = min(max_g, -(-m // 2))                # keep >= 2 grid steps (v7x)
    g = 1
    for cand in range(1, max_g + 1):                  # largest g with <=12.5% pad
        if (-m) % cand <= m // 8:
            g = cand
    tile_b = g * 128
    b_pad = _round_up(b128, tile_b)
    n_steps = b_pad // tile_b

    x_p = jnp.pad(x, ((0, b_pad - B), (0, 0))).astype(dtype)

    resident = lambda i: (0, 0)                       # weights: same block every step

    # ---- explicit scoped-VMEM budget (resident weights double-buffered) -----
    resident_bytes = (D * wcols * itemsize + wcols * 4
                      + 2 * Hp * Hp * itemsize + Hp * 4)
    stream_bytes = 2 * (tile_b * D * itemsize + g * 128 * 4)
    tmp_bytes = tile_b * (wcols + 4 * Hp) * 4
    vmem_limit = int(2 * resident_bytes + stream_bytes + tmp_bytes + (8 << 20))
    vmem_limit = max(min(vmem_limit, 128 << 20), 32 << 20)

    flops = 2 * b_pad * (D * wcols + 2 * Hp * Hp + Hp) + 8 * b_pad * Hp
    bytes_accessed = (b_pad * D * itemsize                         # x read
                      + (D * wcols + 2 * Hp * Hp) * itemsize       # weights
                      + (wcols + Hp) * 4                           # f32 biases/row
                      + b_pad * 4)                                 # packed output

    out = pl.pallas_call(
        functools.partial(_icnn_kernel, hp=Hp, tile_b=tile_b),
        out_shape=jax.ShapeDtypeStruct((n_steps, g, 128), jnp.float32),
        grid_spec=pltpu.PrefetchScalarGridSpec(
            num_scalar_prefetch=0,
            grid=(n_steps,),
            in_specs=[
                pl.BlockSpec((tile_b, D), lambda i: (i, 0)),    # x tile (streamed)
                pl.BlockSpec((D, wcols), resident),             # fused W
                pl.BlockSpec((1, wcols), resident),             # fused b
                pl.BlockSpec((Hp, Hp), resident),               # W2c
                pl.BlockSpec((Hp, Hp), resident),               # W3c
                pl.BlockSpec((1, Hp), resident),                # Wlc row
            ],
            out_specs=pl.BlockSpec((1, g, 128), lambda i: (i, 0, 0)),
        ),
        compiler_params=pltpu.CompilerParams(
            dimension_semantics=("parallel",),
            vmem_limit_bytes=vmem_limit),
        cost_estimate=pl.CostEstimate(
            flops=int(flops), transcendentals=0,
            bytes_accessed=int(bytes_accessed)),
    )(x_p, w_all, b_all, w2c, w3c, wlc_row)

    return out.reshape(-1)[:B].reshape(B, 1)


def init_params(key, input_dim, hidden_dim):
    """Deterministic parameter init. Weights stored transposed: (in, out)."""
    ks = jax.random.split(key, 12)

    def lin(k, fan_in, fan_out):
        bound = 1.0 / jnp.sqrt(fan_in)
        return jax.random.uniform(
            k, (fan_in, fan_out), jnp.float32, minval=-bound, maxval=bound)

    def bias(k, fan_in, fan_out):
        bound = 1.0 / jnp.sqrt(fan_in)
        return jax.random.uniform(
            k, (1, fan_out), jnp.float32, minval=-bound, maxval=bound)

    D, H = input_dim, hidden_dim
    return {
        "w1n": lin(ks[0], D, H), "b1": bias(ks[1], D, H),
        "w2n": lin(ks[2], D, H), "b2": bias(ks[3], D, H),
        # ConvexLinear weights are flagged be_positive; keep them nonnegative
        "w2c": jnp.abs(lin(ks[4], H, H)),
        "w3n": lin(ks[5], D, H), "b3": bias(ks[6], D, H),
        "w3c": jnp.abs(lin(ks[7], H, H)),
        "wlc": jnp.abs(lin(ks[8], H, 1)),
        "wln": lin(ks[9], D, 1), "bl": bias(ks[10], D, 1),
    }


def reference_forward(x, p):
    """Pure-JAX reference for correctness check."""
    relu = lambda v: jnp.maximum(v, 0.0)
    h1 = relu(x @ p["w1n"] + p["b1"]) ** 2
    h2 = relu(h1 @ p["w2c"] + (x @ p["w2n"] + p["b2"]))
    h3 = relu(h2 @ p["w3c"] + (x @ p["w3n"] + p["b3"]))
    return (h3 @ p["wlc"] + (x @ p["wln"] + p["bl"])) ** 2


if __name__ == "__main__":
    B, D, H = 8, 16, 32
    key = jax.random.PRNGKey(0)
    kx, kp = jax.random.split(key)
    x = jax.random.normal(kx, (B, D), dtype=jnp.float32)
    params = init_params(kp, D, H)

    out = icnn_forward(x, params)              # exact f32 path
    out = jax.block_until_ready(out)

    ref = reference_forward(x, params)
    assert out.shape == (B, 1)
    assert jnp.allclose(out, ref, atol=1e-5, rtol=1e-5)
    print("KERNEL_OK")
</pallas_src>

<mosaic_0001>
module attributes {stable_mosaic.version = 11 : i64} {
  func.func @_icnn_kernel(%arg0: i32, %arg1: memref<128x16xf32, #tpu.memory_space<vmem>>, %arg2: memref<16x512xf32, #tpu.memory_space<vmem>>, %arg3: memref<1x512xf32, #tpu.memory_space<vmem>>, %arg4: memref<128x128xf32, #tpu.memory_space<vmem>>, %arg5: memref<128x128xf32, #tpu.memory_space<vmem>>, %arg6: memref<1x128xf32, #tpu.memory_space<vmem>>, %arg7: memref<1x1x128xf32, #tpu.memory_space<vmem>>) attributes {dimension_semantics = [#tpu.dimension_semantics<parallel>], iteration_bounds = array<i64: 1>, scalar_prefetch = 0 : i64, scratch_operands = 0 : i64, tpu.core_type = #tpu.core_type<tc>, window_params = [{transform_indices = @transform_0, window_bounds = array<i64: 128, 16>}, {pipeline_mode = #tpu.pipeline_mode<synchronous>, transform_indices = @transform_1, window_bounds = array<i64: 16, 512>}, {pipeline_mode = #tpu.pipeline_mode<synchronous>, transform_indices = @transform_2, window_bounds = array<i64: 1, 512>}, {pipeline_mode = #tpu.pipeline_mode<synchronous>, transform_indices = @transform_3, window_bounds = array<i64: 128, 128>}, {pipeline_mode = #tpu.pipeline_mode<synchronous>, transform_indices = @transform_4, window_bounds = array<i64: 128, 128>}, {pipeline_mode = #tpu.pipeline_mode<synchronous>, transform_indices = @transform_5, window_bounds = array<i64: 1, 128>}, {transform_indices = @transform_6, window_bounds = array<i64: 1, 1, 128>}]} {
    %c0 = arith.constant 0 : index
    %c0_0 = arith.constant 0 : index
    %0 = vector.load %arg1[%c0, %c0_0] : memref<128x16xf32, #tpu.memory_space<vmem>>, vector<128x16xf32>
    %c0_1 = arith.constant 0 : index
    %c0_2 = arith.constant 0 : index
    %1 = vector.load %arg2[%c0_1, %c0_2] : memref<16x512xf32, #tpu.memory_space<vmem>>, vector<16x512xf32>
    %cst = arith.constant dense<0.000000e+00> : vector<128x512xf32>
    %2 = tpu.matmul %0, %1, %cst {dimension_numbers = #tpu.dot_dimension_numbers<[1], [0], [0], [1], [0, 0, 1, 1], [], []>} : vector<128x16xf32>, vector<16x512xf32>, vector<128x512xf32> -> vector<128x512xf32>
    %c0_3 = arith.constant 0 : index
    %c0_4 = arith.constant 0 : index
    %3 = vector.load %arg3[%c0_3, %c0_4] : memref<1x512xf32, #tpu.memory_space<vmem>>, vector<1x512xf32>
    %4 = vector.broadcast %3 : vector<1x512xf32> to vector<128x512xf32>
    %5 = arith.addf %2, %4 : vector<128x512xf32>
    %6 = vector.extract_strided_slice %5 {offsets = [0, 0], sizes = [128, 128], strides = [1, 1]} : vector<128x512xf32> to vector<128x128xf32>
    %7 = vector.extract_strided_slice %5 {offsets = [0, 128], sizes = [128, 128], strides = [1, 1]} : vector<128x512xf32> to vector<128x128xf32>
    %8 = vector.extract_strided_slice %5 {offsets = [0, 256], sizes = [128, 128], strides = [1, 1]} : vector<128x512xf32> to vector<128x128xf32>
    %9 = vector.extract_strided_slice %5 {offsets = [0, 384], sizes = [128, 128], strides = [1, 1]} : vector<128x512xf32> to vector<128x128xf32>
    %cst_5 = arith.constant 0.000000e+00 : f32
    %10 = vector.broadcast %cst_5 : f32 to vector<128x128xf32>
    %11 = arith.maximumf %6, %10 : vector<128x128xf32>
    %12 = arith.mulf %11, %11 : vector<128x128xf32>
    %c0_6 = arith.constant 0 : index
    %c0_7 = arith.constant 0 : index
    %13 = vector.load %arg4[%c0_6, %c0_7] : memref<128x128xf32, #tpu.memory_space<vmem>>, vector<128x128xf32>
    %cst_8 = arith.constant dense<0.000000e+00> : vector<128x128xf32>
    %14 = tpu.matmul %12, %13, %cst_8 {dimension_numbers = #tpu.dot_dimension_numbers<[1], [0], [0], [1], [0, 0, 1, 1], [], []>} : vector<128x128xf32>, vector<128x128xf32>, vector<128x128xf32> -> vector<128x128xf32>
    %15 = arith.addf %14, %7 : vector<128x128xf32>
    %cst_9 = arith.constant 0.000000e+00 : f32
    %16 = vector.broadcast %cst_9 : f32 to vector<128x128xf32>
    %17 = arith.maximumf %15, %16 : vector<128x128xf32>
    %c0_10 = arith.constant 0 : index
    %c0_11 = arith.constant 0 : index
    %18 = vector.load %arg5[%c0_10, %c0_11] : memref<128x128xf32, #tpu.memory_space<vmem>>, vector<128x128xf32>
    %cst_12 = arith.constant dense<0.000000e+00> : vector<128x128xf32>
    %19 = tpu.matmul %17, %18, %cst_12 {dimension_numbers = #tpu.dot_dimension_numbers<[1], [0], [0], [1], [0, 0, 1, 1], [], []>} : vector<128x128xf32>, vector<128x128xf32>, vector<128x128xf32> -> vector<128x128xf32>
    %20 = arith.addf %19, %8 : vector<128x128xf32>
    %cst_13 = arith.constant 0.000000e+00 : f32
    %21 = vector.broadcast %cst_13 : f32 to vector<128x128xf32>
    %22 = arith.maximumf %20, %21 : vector<128x128xf32>
    %c0_14 = arith.constant 0 : index
    %c0_15 = arith.constant 0 : index
    %23 = vector.load %arg6[%c0_14, %c0_15] : memref<1x128xf32, #tpu.memory_space<vmem>>, vector<1x128xf32>
    %24 = vector.broadcast %23 : vector<1x128xf32> to vector<128x128xf32>
    %25 = arith.mulf %22, %24 : vector<128x128xf32>
    %cst_16 = arith.constant dense<0.000000e+00> : vector<128xf32>
    %26 = vector.multi_reduction <add>, %25, %cst_16 [1] : vector<128x128xf32> to vector<128xf32>
    %27 = vector.shape_cast %26 : vector<128xf32> to vector<128x1xf32>
    %28 = vector.broadcast %27 : vector<128x1xf32> to vector<128x128xf32>
    %29 = arith.addf %28, %9 : vector<128x128xf32>
    %30 = arith.mulf %29, %29 : vector<128x128xf32>
    %31 = tpu.iota {dimensions = array<i32: 0>} : vector<128x128xi32>
    %32 = tpu.iota {dimensions = array<i32: 1>} : vector<128x128xi32>
    %33 = arith.cmpi eq, %31, %32 : vector<128x128xi32>
    %34 = arith.extui %33 : vector<128x128xi1> to vector<128x128xi32>
    %35 = arith.sitofp %34 : vector<128x128xi32> to vector<128x128xf32>
    %36 = arith.mulf %30, %35 : vector<128x128xf32>
    %cst_17 = arith.constant dense<0.000000e+00> : vector<128xf32>
    %37 = vector.multi_reduction <add>, %36, %cst_17 [0] : vector<128x128xf32> to vector<128xf32>
    %38 = vector.shape_cast %37 : vector<128xf32> to vector<1x128xf32>
    %39 = vector.shape_cast %38 : vector<1x128xf32> to vector<1x1x128xf32>
    %c0_18 = arith.constant 0 : index
    %c0_19 = arith.constant 0 : index
    %c0_20 = arith.constant 0 : index
    %40 = vector.load %arg7[%c0_18, %c0_19, %c0_20] : memref<1x1x128xf32, #tpu.memory_space<vmem>>, vector<1x1x128xf32>
    tpu.vector_store %arg7[%c0_18, %c0_19, %c0_20], %39 {strides = array<i32>} : memref<1x1x128xf32, #tpu.memory_space<vmem>>, vector<1x1x128xf32>,
    return
  }
  func.func @transform_0(%arg0: i32) -> (i32, i32) {
    %c0_i32 = arith.constant 0 : i32
    %c0_i32_0 = arith.constant 0 : i32
    return %arg0, %c0_i32 : i32, i32
  }
  func.func @transform_1(%arg0: i32) -> (i32, i32) {
    %c0_i32 = arith.constant 0 : i32
    %c0_i32_0 = arith.constant 0 : i32
    %c0_i32_1 = arith.constant 0 : i32
    return %c0_i32, %c0_i32_0 : i32, i32
  }
  func.func @transform_2(%arg0: i32) -> (i32, i32) {
    %c0_i32 = arith.constant 0 : i32
    %c0_i32_0 = arith.constant 0 : i32
    %c0_i32_1 = arith.constant 0 : i32
    return %c0_i32, %c0_i32_0 : i32, i32
  }
  func.func @transform_3(%arg0: i32) -> (i32, i32) {
    %c0_i32 = arith.constant 0 : i32
    %c0_i32_0 = arith.constant 0 : i32
    %c0_i32_1 = arith.constant 0 : i32
    return %c0_i32, %c0_i32_0 : i32, i32
  }
  func.func @transform_4(%arg0: i32) -> (i32, i32) {
    %c0_i32 = arith.constant 0 : i32
    %c0_i32_0 = arith.constant 0 : i32
    %c0_i32_1 = arith.constant 0 : i32
    return %c0_i32, %c0_i32_0 : i32, i32
  }
  func.func @transform_5(%arg0: i32) -> (i32, i32) {
    %c0_i32 = arith.constant 0 : i32
    %c0_i32_0 = arith.constant 0 : i32
    %c0_i32_1 = arith.constant 0 : i32
    return %c0_i32, %c0_i32_0 : i32, i32
  }
  func.func @transform_6(%arg0: i32) -> (i32, i32, i32) {
    %c0_i32 = arith.constant 0 : i32
    %c0_i32_0 = arith.constant 0 : i32
    %c0_i32_1 = arith.constant 0 : i32
    return %arg0, %c0_i32, %c0_i32_0 : i32, i32, i32
  }
}

</mosaic_0001>

<bundles_post_ra>
// kernel: icnn_forward.1
= control target key start
LH: loop header
LB: loop body
LE: loop exit
PB: predicated region body
PF: predicated region fallthrough
CT: control target
= control target key end

     0   :  { %v1966_v3 = vmov 0.0   ;;  %vm69_vm0 = vcmask 130048   ;;  %s1959_s1 = inlined_call_operand.vmem [shape: f32[16,512], index: 1, kind: input, shape index: {}]   ;;  %s1960_s0 = inlined_call_operand.vmem [shape: f32[128,16], index: 0, kind: input, shape index: {}]   ;;  %s1961_s3 = inlined_call_operand.vmem [shape: f32[128,128], index: 3, kind: input, shape index: {}]   ;;  %s1962_s4 = inlined_call_operand.vmem [shape: f32[128,128], index: 4, kind: input, shape index: {}]   ;;  %s1963_s2 = inlined_call_operand.vmem [shape: f32[1,512], index: 2, kind: input, shape index: {}]   ;;  %s1964_s5 = inlined_call_operand.vmem [shape: f32[1,128], index: 5, kind: input, shape index: {}]   ;;  %s1965_s6 = inlined_call_operand.vmem [shape: f32[1,1,128], index: 6, kind: output, shape index: {}]  }
   0x1   :  { %v40_v0 = vld [vmem:[%s1959_s1 + $0x8] sm:$0xff]  ;;  %v39_v2 = vld [vmem:[%s1959_s1] sm:$0xff]  ;;  %182 = vmatprep.mubr.f32.mxu0 %v1966_v3  ;;  %343 = vmatprep.mubr.f32.mxu1 %v1966_v3  ;;  %v474_v10 = vld [vmem:[%s1961_s3 + $0x10] sm:$0xff] }
   0x2   :  { %v44_v1 = vld [vmem:[%s1959_s1 + $0x28] sm:$0xff]  ;;  %v43_v5 = vld [vmem:[%s1959_s1 + $0x20] sm:$0xff]  ;;  %v475_v11 = vld [vmem:[%s1961_s3 + $0x18] sm:$0xff] }
   0x3   :  { %v1247_v4 = vpack.c.bf16 %v44_v1, %v40_v0  ;;  %v1249_v6 = vpack.c.bf16 %v43_v5, %v39_v2  ;;  %v1373_v7 = vld [vmem:[%s1960_s0] sm:$0xff]  ;;  %v473_v9 = vld [vmem:[%s1961_s3 + $0x8] sm:$0xff]  ;;  %v1259_v14 = vpack.c.bf16 %v475_v11, %v474_v10  ;;  %v1407_v17 = vld [vmem:[%s1960_s0 + $0x10] sm:$0xff]  ;;  %v1968_v11 = vlaneseq }
   0x4   :  { %v472_v8 = vld [vmem:[%s1961_s3] sm:$0xff]  ;;  %v1393_v12 = vld [vmem:[%s1960_s0 + $0x8] sm:$0xff]  ;;  %v478_v19 = vld [vmem:[%s1961_s3 + $0x30] sm:$0xff] }
   0x5   :  { %1248 = vmatprep.subr.bf16.mxu0 %v1247_v4  ;;  %v1255_v13 = vpack.c.bf16 %v473_v9, %v472_v8  ;;  %v476_v15 = vld [vmem:[%s1961_s3 + $0x20] sm:$0xff]  ;;  %v477_v16 = vld [vmem:[%s1961_s3 + $0x28] sm:$0xff]  ;;  %v479_v20 = vld [vmem:[%s1961_s3 + $0x38] sm:$0xff] }
   0x6   :  { %1250 = vmatpush1.bf16.msra.mxu0 %v1249_v6  ;;  %v1263_v18 = vpack.c.bf16 %v477_v16, %v476_v15  ;;  %v1421_v21 = vld [vmem:[%s1960_s0 + $0x18] sm:$0xff]  ;;  %v1267_v22 = vpack.c.bf16 %v479_v20, %v478_v19  ;;  %v480_v23 = vld [vmem:[%s1961_s3 + $0x40] sm:$0xff]  ;;  %v481_v24 = vld [vmem:[%s1961_s3 + $0x48] sm:$0xff] }
   0x7   :  { %1256 = vmatprep.subr.bf16.mxu0 %v1255_v13  ;;  %v1435_v25 = vld [vmem:[%s1960_s0 + $0x20] sm:$0xff]  ;;  %v1271_v26 = vpack.c.bf16 %v481_v24, %v480_v23  ;;  %v482_v27 = vld [vmem:[%s1961_s3 + $0x50] sm:$0xff]  ;;  %v483_v28 = vld [vmem:[%s1961_s3 + $0x58] sm:$0xff] }
   0x8   :  { %v1449_v29 = vld [vmem:[%s1960_s0 + $0x28] sm:$0xff]  ;;  %v1275_v30 = vpack.c.bf16 %v483_v28, %v482_v27  ;;  %v1457_v31 = vld [vmem:[%s1960_s0 + $0x30] sm:$0xff]  ;;  %v1465_v32 = vld [vmem:[%s1960_s0 + $0x38] sm:$0xff] }
   0x9   :  { %1022 = vmatmul.mubr.msk.f32.vlgmr.msra.gmra.mrb[0].mxu0 %vm69_vm0, %v1373_v7  ;;  %v1473_v33 = vld [vmem:[%s1960_s0 + $0x40] sm:$0xff]  ;;  %v1481_v34 = vld [vmem:[%s1960_s0 + $0x48] sm:$0xff]  ;;  %v1489_v35 = vld [vmem:[%s1960_s0 + $0x50] sm:$0xff] }
   0xa   :  { %188 = vmatprep.mubr.f32.mxu0 %v1966_v3  ;;  %1258 = vmatpush3.bf16.msra.mxu0 %v1255_v13  ;;  %v1497_v36 = vld [vmem:[%s1960_s0 + $0x58] sm:$0xff]  ;;  %v1505_v37 = vld [vmem:[%s1960_s0 + $0x60] sm:$0xff]  ;;  %v1513_v38 = vld [vmem:[%s1960_s0 + $0x68] sm:$0xff] }
   0xb   :  { %1260 = vmatprep.subr.bf16.mxu0 %v1259_v14  ;;  %v1521_v39 = vld [vmem:[%s1960_s0 + $0x70] sm:$0xff]  ;;  %v1529_v40 = vld [vmem:[%s1960_s0 + $0x78] sm:$0xff]  ;;  %v484_v41 = vld [vmem:[%s1961_s3 + $0x60] sm:$0xff] }
   0xc   :  { %v485_v42 = vld [vmem:[%s1961_s3 + $0x68] sm:$0xff]  ;;  %v486_v44 = vld [vmem:[%s1961_s3 + $0x70] sm:$0xff]  ;;  %v487_v45 = vld [vmem:[%s1961_s3 + $0x78] sm:$0xff] }
   0xd   :  { %1023 = vmatmul.mubr.msk.f32.gmra.mrb[2].mxu0 %vm69_vm0, %v1393_v12  ;;  %v1279_v43 = vpack.c.bf16 %v485_v42, %v484_v41  ;;  %v1283_v46 = vpack.c.bf16 %v487_v45, %v486_v44  ;;  %v42_v47 = vld [vmem:[%s1959_s1 + $0x18] sm:$0xff]  ;;  %v41_v49 = vld [vmem:[%s1959_s1 + $0x10] sm:$0xff]  ;;  %v649_v52 = vld [vmem:[%s1962_s4] sm:$0xff] }
   0xe   :  { %194 = vmatprep.mubr.f32.mxu0 %v1966_v3  ;;  %1262 = vmatpush3.bf16.msra.mxu0 %v1259_v14  ;;  %v46_v48 = vld [vmem:[%s1959_s1 + $0x38] sm:$0xff]  ;;  %v45_v51 = vld [vmem:[%s1959_s1 + $0x30] sm:$0xff]  ;;  %v650_v53 = vld [vmem:[%s1962_s4 + $0x8] sm:$0xff] }
   0xf   :  { %1264 = vmatprep.subr.bf16.mxu0 %v1263_v18  ;;  %v1251_v50 = vpack.c.bf16 %v46_v48, %v42_v47  ;;  %v1253_v54 = vpack.c.bf16 %v45_v51, %v41_v49  ;;  %v1287_v55 = vpack.c.bf16 %v650_v53, %v649_v52  ;;  %v651_v56 = vld [vmem:[%s1962_s4 + $0x10] sm:$0xff]  ;;  %v652_v57 = vld [vmem:[%s1962_s4 + $0x18] sm:$0xff]  ;;  %v653_v59 = vld [vmem:[%s1962_s4 + $0x20] sm:$0xff] }
  0x10   :  { %v1291_v58 = vpack.c.bf16 %v652_v57, %v651_v56  ;;  %v654_v60 = vld [vmem:[%s1962_s4 + $0x28] sm:$0xff]  ;;  %v655_v62 = vld [vmem:[%s1962_s4 + $0x30] sm:$0xff]  ;;  %v656_v63 = vld [vmem:[%s1962_s4 + $0x38] sm:$0xff] }
  0x11   :  { %1024 = vmatmul.mubr.msk.f32.gmra.mrb[4].mxu0 %vm69_vm0, %v1407_v17  ;;  %1252 = vmatprep.subr.bf16.mxu1 %v1251_v50  ;;  %v1295_v61 = vpack.c.bf16 %v654_v60, %v653_v59  ;;  %v1299_v0 = vpack.c.bf16 %v656_v63, %v655_v62  ;;  %v657_v1 = vld [vmem:[%s1962_s4 + $0x40] sm:$0xff]  ;;  %v658_v2 = vld [vmem:[%s1962_s4 + $0x48] sm:$0xff]  ;;  %v659_v5 = vld [vmem:[%s1962_s4 + $0x50] sm:$0xff] }
  0x12   :  { %200 = vmatprep.mubr.f32.mxu0 %v1966_v3  ;;  %1266 = vmatpush3.bf16.msra.mxu0 %v1263_v18  ;;  %v1303_v4 = vpack.c.bf16 %v658_v2, %v657_v1  ;;  %v660_v6 = vld [vmem:[%s1962_s4 + $0x58] sm:$0xff]  ;;  %v661_v8 = vld [vmem:[%s1962_s4 + $0x60] sm:$0xff]  ;;  %v662_v9 = vld [vmem:[%s1962_s4 + $0x68] sm:$0xff] }
  0x13   :  { %1268 = vmatprep.subr.bf16.mxu0 %v1267_v22  ;;  %1254 = vmatpush1.bf16.msra.mxu1 %v1253_v54  ;;  %v1311_v10 = vpack.c.bf16 %v662_v9, %v661_v8  ;;  %v1642_v14 = vld [vmem:[%s1963_s2] sm:$0xf] }
  0x14   :  { %1288 = vmatprep.subr.bf16.mxu1 %v1287_v55 }
  0x15   :  { %1025 = vmatmul.mubr.msk.f32.gmra.mrb[6].mxu0 %vm69_vm0, %v1421_v21 }
  0x16   :  { %206 = vmatprep.mubr.f32.mxu0 %v1966_v3  ;;  %1270 = vmatpush3.bf16.msra.mxu0 %v1267_v22 }
  0x17   :  { %1272 = vmatprep.subr.bf16.mxu0 %v1271_v26  ;;  %1038 = vmatmul.mubr.msk.f32.vlgmr.msra.gmra.mrb[0].mxu1 %vm69_vm0, %v1373_v7  ;;  %v1307_v7 = vpack.c.bf16 %v660_v6, %v659_v5 }
  0x18   :  { %349 = vmatprep.mubr.f32.mxu1 %v1966_v3  ;;  %1290 = vmatpush3.bf16.msra.mxu1 %v1287_v55 }
  0x19   :  { %1026 = vmatmul.mubr.msk.f32.gmra.mrb[8].mxu0 %vm69_vm0, %v1435_v25  ;;  %1292 = vmatprep.subr.bf16.mxu1 %v1291_v58 }
  0x1a   :  { %212 = vmatprep.mubr.f32.mxu0 %v1966_v3  ;;  %1274 = vmatpush3.bf16.msra.mxu0 %v1271_v26 }
  0x1b   :  { %1276 = vmatprep.subr.bf16.mxu0 %v1275_v30  ;;  %1039 = vmatmul.mubr.msk.f32.gmra.mrb[2].mxu1 %vm69_vm0, %v1393_v12  ;;  %v1633_v12 = vshrl.u32 %v1968_v11, 7 }
  0x1c   :  { %355 = vmatprep.mubr.f32.mxu1 %v1966_v3  ;;  %1294 = vmatpush3.bf16.msra.mxu1 %v1291_v58 }
  0x1d   :  { %1027 = vmatmul.mubr.msk.f32.gmra.mrb[10].mxu0 %vm69_vm0, %v1449_v29  ;;  %1296 = vmatprep.subr.bf16.mxu1 %v1295_v61  ;;  %v51_v13 = vsub.s32 0, %v1633_v12 }
  0x1e   :  { %218 = vmatprep.mubr.f32.mxu0 %v1966_v3  ;;  %1278 = vmatpush3.bf16.msra.mxu0 %v1275_v30 }
  0x1f   :  { %1280 = vmatprep.subr.bf16.mxu0 %v1279_v43  ;;  %1040 = vmatmul.mubr.msk.f32.gmra.mrb[4].mxu1 %vm69_vm0, %v1407_v17  ;;  %v1648_v15 = vrot.slane %v1642_v14, %v51_v13 }
  0x20   :  { %361 = vmatprep.mubr.f32.mxu1 %v1966_v3  ;;  %1298 = vmatpush3.bf16.msra.mxu1 %v1295_v61 }
  0x21   :  { %1028 = vmatmul.mubr.msk.f32.gmra.mrb[12].mxu0 %vm69_vm0, %v1457_v31  ;;  %1300 = vmatprep.subr.bf16.mxu1 %v1299_v0 }
  0x22   :  { %224 = vmatprep.mubr.f32.mxu0 %v1966_v3  ;;  %1282 = vmatpush3.bf16.msra.mxu0 %v1279_v43 }
  0x23   :  { %1284 = vmatprep.subr.bf16.mxu0 %v1283_v46  ;;  %1041 = vmatmul.mubr.msk.f32.gmra.mrb[6].mxu1 %vm69_vm0, %v1421_v21 }
  0x24   :  { %367 = vmatprep.mubr.f32.mxu1 %v1966_v3  ;;  %1302 = vmatpush3.bf16.msra.mxu1 %v1299_v0 }
  0x25   :  { %1029 = vmatmul.mubr.msk.f32.gmra.mrb[14].mxu0 %vm69_vm0, %v1465_v32  ;;  %1304 = vmatprep.subr.bf16.mxu1 %v1303_v4 }
  0x26   :  { %230 = vmatprep.mubr.f32.mxu0 %v1966_v3  ;;  %1286 = vmatpush3.bf16.msra.mxu0 %v1283_v46 }
  0x27   :  { %1042 = vmatmul.mubr.msk.f32.gmra.mrb[8].mxu1 %vm69_vm0, %v1435_v25 }
  0x28   :  { %373 = vmatprep.mubr.f32.mxu1 %v1966_v3  ;;  %1306 = vmatpush3.bf16.msra.mxu1 %v1303_v4 }
  0x29   :  { %1030 = vmatmul.mubr.msk.f32.gmra.mrb[16].mxu0 %vm69_vm0, %v1473_v33  ;;  %1308 = vmatprep.subr.bf16.mxu1 %v1307_v7 }
  0x2a   :  { %236 = vmatprep.mubr.f32.mxu0 %v1966_v3 }
  0x2b   :  { %1043 = vmatmul.mubr.msk.f32.gmra.mrb[10].mxu1 %vm69_vm0, %v1449_v29 }
  0x2c   :  { %379 = vmatprep.mubr.f32.mxu1 %v1966_v3  ;;  %1310 = vmatpush3.bf16.msra.mxu1 %v1307_v7 }
  0x2d   :  { %1031 = vmatmul.mubr.msk.f32.gmra.mrb[18].mxu0 %vm69_vm0, %v1481_v34  ;;  %1312 = vmatprep.subr.bf16.mxu1 %v1311_v10 }
  0x2e   :  { %242 = vmatprep.mubr.f32.mxu0 %v1966_v3 }
  0x2f   :  { %1044 = vmatmul.mubr.msk.f32.gmra.mrb[12].mxu1 %vm69_vm0, %v1457_v31 }
  0x30   :  { %385 = vmatprep.mubr.f32.mxu1 %v1966_v3  ;;  %1314 = vmatpush3.bf16.msra.mxu1 %v1311_v10 }
  0x31   :  { %1032 = vmatmul.mubr.msk.f32.gmra.mrb[20].mxu0 %vm69_vm0, %v1489_v35 }
  0x32   :  { %248 = vmatprep.mubr.f32.mxu0 %v1966_v3 }
  0x33   :  { %1045 = vmatmul.mubr.msk.f32.gmra.mrb[14].mxu1 %vm69_vm0, %v1465_v32 }
  0x34   :  { %391 = vmatprep.mubr.f32.mxu1 %v1966_v3 }
  0x35   :  { %1033 = vmatmul.mubr.msk.f32.gmra.mrb[22].mxu0 %vm69_vm0, %v1497_v36 }
  0x36   :  { %254 = vmatprep.mubr.f32.mxu0 %v1966_v3 }
  0x37   :  { %1046 = vmatmul.mubr.msk.f32.gmra.mrb[16].mxu1 %vm69_vm0, %v1473_v33 }
  0x38   :  { %397 = vmatprep.mubr.f32.mxu1 %v1966_v3 }
  0x39   :  { %1034 = vmatmul.mubr.msk.f32.gmra.mrb[24].mxu0 %vm69_vm0, %v1505_v37 }
  0x3a   :  { %260 = vmatprep.mubr.f32.mxu0 %v1966_v3 }
  0x3b   :  { %1047 = vmatmul.mubr.msk.f32.gmra.mrb[18].mxu1 %vm69_vm0, %v1481_v34 }
  0x3c   :  { %403 = vmatprep.mubr.f32.mxu1 %v1966_v3 }
  0x3d   :  { %1035 = vmatmul.mubr.msk.f32.gmra.mrb[26].mxu0 %vm69_vm0, %v1513_v38 }
  0x3e   :  { %266 = vmatprep.mubr.f32.mxu0 %v1966_v3 }
  0x3f   :  { %1048 = vmatmul.mubr.msk.f32.gmra.mrb[20].mxu1 %vm69_vm0, %v1489_v35 }
  0x40   :  { %409 = vmatprep.mubr.f32.mxu1 %v1966_v3 }
  0x41   :  { %1036 = vmatmul.mubr.msk.f32.gmra.mrb[28].mxu0 %vm69_vm0, %v1521_v39 }
  0x42   :  { %272 = vmatprep.mubr.f32.mxu0 %v1966_v3 }
  0x43   :  { %1049 = vmatmul.mubr.msk.f32.gmra.mrb[22].mxu1 %vm69_vm0, %v1497_v36 }
  0x44   :  { %415 = vmatprep.mubr.f32.mxu1 %v1966_v3 }
  0x45   :  { %1037 = vmatmul.mubr.msk.f32.gmra.mrb[30].mxu0 %vm69_vm0, %v1529_v40 }
  0x47   :  { %1050 = vmatmul.mubr.msk.f32.gmra.mrb[24].mxu1 %vm69_vm0, %v1505_v37 }
  0x48   :  { %421 = vmatprep.mubr.f32.mxu1 %v1966_v3 }
  0x4b   :  { %1051 = vmatmul.mubr.msk.f32.gmra.mrb[26].mxu1 %vm69_vm0, %v1513_v38 }
  0x4c   :  { %427 = vmatprep.mubr.f32.mxu1 %v1966_v3 }
  0x4f   :  { %1052 = vmatmul.mubr.msk.f32.gmra.mrb[28].mxu1 %vm69_vm0, %v1521_v39 }
  0x50   :  { %433 = vmatprep.mubr.f32.mxu1 %v1966_v3 }
  0x53   :  { %1053 = vmatmul.mubr.msk.f32.gmra.mrb[30].mxu1 %vm69_vm0, %v1529_v40 }
  0xdc   :  { %v184_v16 = vpop.f32.mrb[0].mxu0 }
  0xdd   :  { %v185_v17 = vadd.f32 %v184_v16, %v1648_v15  ;;  %v1654_v18 = vpop.f32.mrb[1].mxu0 }
  0xdf   :  { %v440_v19 = vmax.f32 %v185_v17, 0.0 }
  0xe0   :  { %v190_v20 = vpop.f32.mrb[2].mxu0 }
  0xe1   :  { %v456_v21 = vmul.f32 %v440_v19, %v440_v19  ;;  %v191_v22 = vadd.f32 %v190_v20, %v1648_v15  ;;  %v1660_v23 = vpop.f32.mrb[3].mxu0 }
  0xe3   :  { %v441_v24 = vmax.f32 %v191_v22, 0.0  ;;  %1167 = vmatprep.mubr.f32.mxu0 %v456_v21 }
  0xe4   :  { %v196_v25 = vpop.f32.mrb[4].mxu0 }
  0xe5   :  { %v457_v26 = vmul.f32 %v441_v24, %v441_v24  ;;  %v197_v27 = vadd.f32 %v196_v25, %v1648_v15  ;;  %v1665_v28 = vpop.f32.mrb[5].mxu0 }
  0xe7   :  { %v442_v29 = vmax.f32 %v197_v27, 0.0  ;;  %1168 = vmatmul.mubr.f32.vlgmr.msra.gmra.mrb[32].mxu0 %v457_v26 }
  0xe8   :  { %v202_v30 = vpop.f32.mrb[6].mxu0 }
  0xe9   :  { %v458_v31 = vmul.f32 %v442_v29, %v442_v29  ;;  %v203_v32 = vadd.f32 %v202_v30, %v1648_v15  ;;  %v1668_v33 = vpop.f32.mrb[7].mxu0 }
  0xeb   :  { %v443_v34 = vmax.f32 %v203_v32, 0.0  ;;  %1170 = vmatprep.mubr.f32.mxu0 %v458_v31 }
  0xec   :  { %v208_v35 = vpop.f32.mrb[8].mxu0 }
  0xed   :  { %v459_v36 = vmul.f32 %v443_v34, %v443_v34  ;;  %v209_v37 = vadd.f32 %v208_v35, %v1648_v15  ;;  %v1671_v38 = vpop.f32.mrb[9].mxu0 }
  0xef   :  { %v444_v39 = vmax.f32 %v209_v37, 0.0  ;;  %1171 = vmatmul.mubr.f32.gmra.mrb[34].mxu0 %v459_v36 }
  0xf0   :  { %v214_v40 = vpop.f32.mrb[10].mxu0 }
  0xf1   :  { %v460_v41 = vmul.f32 %v444_v39, %v444_v39  ;;  %v215_v42 = vadd.f32 %v214_v40, %v1648_v15  ;;  %v1674_v43 = vpop.f32.mrb[11].mxu0 }
  0xf3   :  { %v445_v44 = vmax.f32 %v215_v42, 0.0  ;;  %1173 = vmatprep.mubr.f32.mxu0 %v460_v41  ;;  %v663_v42 = vld [vmem:[%s1962_s4 + $0x70] sm:$0xff] }
  0xf4   :  { %v220_v45 = vpop.f32.mrb[12].mxu0 }
  0xf5   :  { %v461_v46 = vmul.f32 %v445_v44, %v445_v44  ;;  %v221_v47 = vadd.f32 %v220_v45, %v1648_v15  ;;  %v1677_v48 = vpop.f32.mrb[13].mxu0  ;;  %v664_v44 = vld [vmem:[%s1962_s4 + $0x78] sm:$0xff] }
  0xf6   :  { %v1315_v45 = vpack.c.bf16 %v664_v44, %v663_v42 }
  0xf7   :  { %v446_v49 = vmax.f32 %v221_v47, 0.0  ;;  %1174 = vmatmul.mubr.f32.gmra.mrb[36].mxu0 %v461_v46  ;;  %v1712_v46 = vpop.f32.mrb[0].mxu1 }
  0xf8   :  { %v226_v50 = vpop.f32.mrb[14].mxu0  ;;  %1316 = vmatprep.subr.bf16.mxu1 %v1315_v45 }
  0xf9   :  { %v462_v51 = vmul.f32 %v446_v49, %v446_v49  ;;  %v227_v52 = vadd.f32 %v226_v50, %v1648_v15  ;;  %v1680_v53 = vpop.f32.mrb[15].mxu0  ;;  %1318 = vmatpush3.bf16.msra.mxu1 %v1315_v45 }
  0xfb   :  { %v447_v54 = vmax.f32 %v227_v52, 0.0  ;;  %1176 = vmatprep.mubr.f32.mxu0 %v462_v51 }
  0xfc   :  { %v232_v55 = vpop.f32.mrb[16].mxu0 }
  0xfd   :  { %v463_v56 = vmul.f32 %v447_v54, %v447_v54  ;;  %v233_v57 = vadd.f32 %v232_v55, %v1648_v15  ;;  %v1683_v58 = vpop.f32.mrb[17].mxu0 }
  0xff   :  { %v448_v59 = vmax.f32 %v233_v57, 0.0  ;;  %1177 = vmatmul.mubr.f32.gmra.mrb[38].mxu0 %v463_v56 }
 0x100   :  { %v238_v60 = vpop.f32.mrb[18].mxu0 }
 0x101   :  { %v464_v61 = vmul.f32 %v448_v59, %v448_v59  ;;  %v239_v62 = vadd.f32 %v238_v60, %v1648_v15  ;;  %v1686_v63 = vpop.f32.mrb[19].mxu0 }
 0x103   :  { %v449_v0 = vmax.f32 %v239_v62, 0.0  ;;  %1179 = vmatprep.mubr.f32.mxu0 %v464_v61 }
 0x104   :  { %v244_v1 = vpop.f32.mrb[20].mxu0 }
 0x105   :  { %v465_v2 = vmul.f32 %v449_v0, %v449_v0  ;;  %v245_v4 = vadd.f32 %v244_v1, %v1648_v15  ;;  %v1689_v5 = vpop.f32.mrb[21].mxu0 }
 0x107   :  { %v450_v6 = vmax.f32 %v245_v4, 0.0  ;;  %1180 = vmatmul.mubr.f32.gmra.mrb[40].mxu0 %v465_v2 }
 0x108   :  { %v250_v7 = vpop.f32.mrb[22].mxu0 }
 0x109   :  { %v466_v8 = vmul.f32 %v450_v6, %v450_v6  ;;  %v251_v9 = vadd.f32 %v250_v7, %v1648_v15  ;;  %v1692_v10 = vpop.f32.mrb[23].mxu0 }
 0x10b   :  { %v451_v13 = vmax.f32 %v251_v9, 0.0  ;;  %1182 = vmatprep.mubr.f32.mxu0 %v466_v8 }
 0x10c   :  { %v256_v16 = vpop.f32.mrb[24].mxu0 }
 0x10d   :  { %v467_v17 = vmul.f32 %v451_v13, %v451_v13  ;;  %v257_v19 = vadd.f32 %v256_v16, %v1648_v15  ;;  %v1695_v20 = vpop.f32.mrb[25].mxu0 }
 0x10f   :  { %v452_v21 = vmax.f32 %v257_v19, 0.0  ;;  %1183 = vmatmul.mubr.f32.gmra.mrb[42].mxu0 %v467_v17 }
 0x110   :  { %v262_v22 = vpop.f32.mrb[26].mxu0 }
 0x111   :  { %v468_v24 = vmul.f32 %v452_v21, %v452_v21  ;;  %v263_v25 = vadd.f32 %v262_v22, %v1648_v15  ;;  %v1698_v26 = vpop.f32.mrb[27].mxu0 }
 0x113   :  { %v453_v27 = vmax.f32 %v263_v25, 0.0  ;;  %1185 = vmatprep.mubr.f32.mxu0 %v468_v24  ;;  %v55_v24 = vsub.s32 1, %v1633_v12 }
 0x114   :  { %v268_v29 = vpop.f32.mrb[28].mxu0 }
 0x115   :  { %v469_v30 = vmul.f32 %v453_v27, %v453_v27  ;;  %v269_v31 = vadd.f32 %v268_v29, %v1648_v15  ;;  %v1701_v32 = vpop.f32.mrb[29].mxu0  ;;  %v1776_v29 = vrot.slane %v1642_v14, %v55_v24 }
 0x117   :  { %v454_v34 = vmax.f32 %v269_v31, 0.0  ;;  %1186 = vmatmul.mubr.f32.gmra.mrb[44].mxu0 %v469_v30  ;;  %v193_v31 = vadd.f32 %v1660_v23, %v1776_v29  ;;  %v205_v44 = vadd.f32 %v1668_v33, %v1776_v29  ;;  %v199_v45 = vadd.f32 %v1665_v28, %v1776_v29 }
 0x118   :  { %v274_v35 = vpop.f32.mrb[30].mxu0 }
 0x119   :  { %v470_v36 = vmul.f32 %v454_v34, %v454_v34  ;;  %v275_v37 = vadd.f32 %v274_v35, %v1648_v15  ;;  %v1704_v39 = vpop.f32.mrb[31].mxu0  ;;  %v1714_v15 = vpop.f32.mrb[1].mxu1  ;;  %v187_v34 = vadd.f32 %v1654_v18, %v1776_v29 }
 0x11a   :  { %v1716_v47 = vpop.f32.mrb[2].mxu1 }
 0x11b   :  { %v455_v40 = vmax.f32 %v275_v37, 0.0  ;;  %1188 = vmatprep.mubr.f32.mxu0 %v470_v36  ;;  %v1718_v49 = vpop.f32.mrb[3].mxu1 }
 0x11c   :  { %v1720_v50 = vpop.f32.mrb[4].mxu1 }
 0x11d   :  { %v471_v41 = vmul.f32 %v455_v40, %v455_v40  ;;  %v1722_v51 = vpop.f32.mrb[5].mxu1 }
 0x11e   :  { %v1724_v52 = vpop.f32.mrb[6].mxu1 }
 0x11f   :  { %1189 = vmatmul.mubr.f32.gmra.mrb[46].mxu0 %v471_v41  ;;  %v1726_v54 = vpop.f32.mrb[7].mxu1 }
 0x120   :  { %v1728_v55 = vpop.f32.mrb[8].mxu1 }
 0x121   :  { %v1730_v56 = vpop.f32.mrb[9].mxu1 }
 0x122   :  { %v1732_v57 = vpop.f32.mrb[10].mxu1 }
 0x123   :  { %v1734_v59 = vpop.f32.mrb[11].mxu1 }
 0x124   :  { %v1736_v60 = vpop.f32.mrb[12].mxu1 }
 0x125   :  { %v1738_v61 = vpop.f32.mrb[13].mxu1 }
 0x126   :  { %v1740_v62 = vpop.f32.mrb[14].mxu1 }
 0x127   :  { %v1742_v0 = vpop.f32.mrb[15].mxu1 }
 0x128   :  { %v1744_v1 = vpop.f32.mrb[16].mxu1 }
 0x129   :  { %v1746_v2 = vpop.f32.mrb[17].mxu1 }
 0x12a   :  { %v1748_v4 = vpop.f32.mrb[18].mxu1 }
 0x12b   :  { %v1750_v6 = vpop.f32.mrb[19].mxu1 }
 0x12c   :  { %v1752_v7 = vpop.f32.mrb[20].mxu1 }
 0x12d   :  { %v1754_v8 = vpop.f32.mrb[21].mxu1 }
 0x12e   :  { %v1756_v9 = vpop.f32.mrb[22].mxu1 }
 0x12f   :  { %v1758_v13 = vpop.f32.mrb[23].mxu1 }
 0x130   :  { %v1760_v16 = vpop.f32.mrb[24].mxu1 }
 0x131   :  { %v1762_v17 = vpop.f32.mrb[25].mxu1 }
 0x132   :  { %v1764_v19 = vpop.f32.mrb[26].mxu1 }
 0x133   :  { %v1766_v21 = vpop.f32.mrb[27].mxu1 }
 0x134   :  { %v1768_v22 = vpop.f32.mrb[28].mxu1 }
 0x135   :  { %v1771_v25 = vpop.f32.mrb[29].mxu1 }
 0x136   :  { %1969 = vst [vmem:[#allocation2_spill] sm:$0xff] %v1771_v25  ;;  %v1773_v27 = vpop.f32.mrb[30].mxu1 }
 0x137   :  { %v1778_v30 = vpop.f32.mrb[31].mxu1 }
 0x1ba   :  { %v1169_v35 = vpop.f32.mrb[32].mxu0 }
 0x1bb   :  { %v560_v36 = vadd.f32 %v1169_v35, %v193_v31  ;;  %v554_v37 = vpop.f32.mrb[33].mxu0  ;;  %v217_v31 = vadd.f32 %v1674_v43, %v1776_v29 }
 0x1bc   :  { %v555_v40 = vadd.f32 %v554_v37, %v187_v34  ;;  %v211_v34 = vadd.f32 %v1671_v38, %v1776_v29 }
 0x1bd   :  { %v634_v42 = vmax.f32 %v560_v36, 0.0 }
 0x1be   :  { %v633_v41 = vmax.f32 %v555_v40, 0.0 }
 0x1c0   :  { %1223 = vmatprep.mubr.f32.mxu1 %v633_v41  ;;  %v229_v41 = vadd.f32 %v1680_v53, %v1776_v29 }
 0x1c1   :  { %1224 = vmatmul.mubr.f32.vlgmr.msra.gmra.mrb[32].mxu1 %v634_v42 }
 0x1c2   :  { %v1172_v24 = vpop.f32.mrb[34].mxu0 }
 0x1c3   :  { %v570_v3 = vadd.f32 %v1172_v24, %v205_v44  ;;  %v564_v23 = vpop.f32.mrb[35].mxu0  ;;  %v235_v24 = vadd.f32 %v1683_v58, %v1776_v29 }
 0x1c4   :  { %v565_v11 = vadd.f32 %v564_v23, %v199_v45  ;;  %v241_v45 = vadd.f32 %v1686_v63, %v1776_v29 }
 0x1c5   :  { %v636_v18 = vmax.f32 %v570_v3, 0.0  ;;  %v223_v3 = vadd.f32 %v1677_v48, %v1776_v29 }
 0x1c6   :  { %v635_v25 = vmax.f32 %v565_v11, 0.0 }
 0x1c8   :  { %1226 = vmatprep.mubr.f32.mxu1 %v635_v25 }
 0x1c9   :  { %1227 = vmatmul.mubr.f32.gmra.mrb[34].mxu1 %v636_v18 }
 0x1ca   :  { %v1175_v35 = vpop.f32.mrb[36].mxu0 }
 0x1cb   :  { %v580_v33 = vadd.f32 %v1175_v35, %v217_v31  ;;  %v574_v36 = vpop.f32.mrb[37].mxu0  ;;  %v253_v35 = vadd.f32 %v1692_v10, %v1776_v29 }
 0x1cc   :  { %v575_v37 = vadd.f32 %v574_v36, %v211_v34 }
 0x1cd   :  { %v638_v28 = vmax.f32 %v580_v33, 0.0  ;;  %v247_v33 = vadd.f32 %v1689_v5, %v1776_v29 }
 0x1ce   :  { %v637_v40 = vmax.f32 %v575_v37, 0.0 }
 0x1d0   :  { %1229 = vmatprep.mubr.f32.mxu1 %v637_v40 }
 0x1d1   :  { %1230 = vmatmul.mubr.f32.gmra.mrb[36].mxu1 %v638_v28 }
 0x1d2   :  { %v1178_v11 = vpop.f32.mrb[38].mxu0 }
 0x1d3   :  { %v590_v43 = vadd.f32 %v1178_v11, %v229_v41  ;;  %v584_v25 = vpop.f32.mrb[39].mxu0  ;;  %v265_v41 = vadd.f32 %v1698_v26, %v1776_v29 }
 0x1d4   :  { %v585_v42 = vadd.f32 %v584_v25, %v223_v3  ;;  %v259_v3 = vadd.f32 %v1695_v20, %v1776_v29 }
 0x1d5   :  { %v640_v38 = vmax.f32 %v590_v43, 0.0 }
 0x1d6   :  { %v639_v44 = vmax.f32 %v585_v42, 0.0 }
 0x1d8   :  { %1232 = vmatprep.mubr.f32.mxu1 %v639_v44  ;;  %v277_v44 = vadd.f32 %v1704_v39, %v1776_v29 }
 0x1d9   :  { %1233 = vmatmul.mubr.f32.gmra.mrb[38].mxu1 %v640_v38  ;;  %v271_v38 = vadd.f32 %v1701_v32, %v1776_v29 }
 0x1da   :  { %v1181_v23 = vpop.f32.mrb[40].mxu0 }
 0x1db   :  { %v600_v53 = vadd.f32 %v1181_v23, %v241_v45  ;;  %v594_v18 = vpop.f32.mrb[41].mxu0 }
 0x1dc   :  { %v595_v31 = vadd.f32 %v594_v18, %v235_v24  ;;  %v59_v18 = vsub.s32 2, %v1633_v12 }
 0x1dd   :  { %v642_v48 = vmax.f32 %v600_v53, 0.0 }
 0x1de   :  { %v641_v34 = vmax.f32 %v595_v31, 0.0  ;;  %v1814_v31 = vrot.slane %v1642_v14, %v59_v18 }
 0x1e0   :  { %1235 = vmatprep.mubr.f32.mxu1 %v641_v34  ;;  %v352_v39 = vadd.f32 %v1716_v47, %v1814_v31  ;;  %v346_v34 = vadd.f32 %v1712_v46, %v1814_v31  ;;  %v358_v47 = vadd.f32 %v1720_v50, %v1814_v31 }
 0x1e1   :  { %1236 = vmatmul.mubr.f32.gmra.mrb[40].mxu1 %v642_v48 }
 0x1e2   :  { %v1184_v36 = vpop.f32.mrb[42].mxu0 }
 0x1e3   :  { %v610_v63 = vadd.f32 %v1184_v36, %v253_v35  ;;  %v604_v37 = vpop.f32.mrb[43].mxu0 }
 0x1e4   :  { %v605_v40 = vadd.f32 %v604_v37, %v247_v33  ;;  %v1823_v33 = vld [vmem:[%s1964_s5] ss:$0 sm:$0xff] }
 0x1e5   :  { %v644_v58 = vmax.f32 %v610_v63, 0.0 }
 0x1e6   :  { %v643_v28 = vmax.f32 %v605_v40, 0.0  ;;  %v364_v40 = vadd.f32 %v1724_v52, %v1814_v31  ;;  %v370_v52 = vadd.f32 %v1728_v55, %v1814_v31  ;;  %v382_v55 = vadd.f32 %v1736_v60, %v1814_v31 }
 0x1e8   :  { %1238 = vmatprep.mubr.f32.mxu1 %v643_v28 }
 0x1e9   :  { %1239 = vmatmul.mubr.f32.gmra.mrb[42].mxu1 %v644_v58 }
 0x1ea   :  { %v1187_v11 = vpop.f32.mrb[44].mxu0 }
 0x1eb   :  { %v620_v10 = vadd.f32 %v1187_v11, %v265_v41  ;;  %v614_v43 = vpop.f32.mrb[45].mxu0 }
 0x1ec   :  { %v615_v25 = vadd.f32 %v614_v43, %v259_v3 }
 0x1ed   :  { %v646_v5 = vmax.f32 %v620_v10, 0.0 }
 0x1ee   :  { %v645_v42 = vmax.f32 %v615_v25, 0.0  ;;  %v376_v25 = vadd.f32 %v1732_v57, %v1814_v31  ;;  %v388_v57 = vadd.f32 %v1740_v62, %v1814_v31  ;;  %v394_v62 = vadd.f32 %v1744_v1, %v1814_v31 }
 0x1f0   :  { %1241 = vmatprep.mubr.f32.mxu1 %v645_v42 }
 0x1f1   :  { %1242 = vmatmul.mubr.f32.gmra.mrb[44].mxu1 %v646_v5 }
 0x1f2   :  { %v1190_v45 = vpop.f32.mrb[46].mxu0 }
 0x1f3   :  { %v630_v26 = vadd.f32 %v1190_v45, %v277_v44  ;;  %v624_v24 = vpop.f32.mrb[47].mxu0 }
 0x1f4   :  { %v625_v23 = vadd.f32 %v624_v24, %v271_v38 }
 0x1f5   :  { %v648_v20 = vmax.f32 %v630_v26, 0.0 }
 0x1f6   :  { %v647_v53 = vmax.f32 %v625_v23, 0.0 }
 0x1f8   :  { %1244 = vmatprep.mubr.f32.mxu1 %v647_v53 }
 0x1f9   :  { %1245 = vmatmul.mubr.f32.gmra.mrb[46].mxu1 %v648_v20 }
 0x294   :  { %v1225_v32 = vpop.f32.mrb[32].mxu1 }
 0x295   :  { %v737_v29 = vadd.f32 %v1225_v32, %v352_v39  ;;  %v731_v48 = vpop.f32.mrb[33].mxu1 }
 0x296   :  { %v732_v35 = vadd.f32 %v731_v48, %v346_v34 }
 0x297   :  { %v811_v63 = vmax.f32 %v737_v29, 0.0 }
 0x298   :  { %v810_v36 = vmax.f32 %v732_v35, 0.0  ;;  %v400_v35 = vadd.f32 %v1748_v4, %v1814_v31  ;;  %v406_v4 = vadd.f32 %v1752_v7, %v1814_v31 }
 0x299   :  { %v834_v3 = vmul.f32 %v1823_v33, %v811_v63 }
 0x29a   :  { %v833_v37 = vmul.f32 %v1823_v33, %v810_v36 }
 0x29c   :  { %v1228_v46 = vpop.f32.mrb[34].mxu1  ;;  %849 = vadd.xlane.f32.xlu0 %v833_v37 }
 0x29d   :  { %v747_v28 = vadd.f32 %v1228_v46, %v364_v40  ;;  %v741_v58 = vpop.f32.mrb[35].mxu1 }
 0x29e   :  { %v742_v41 = vadd.f32 %v741_v58, %v358_v47  ;;  %v412_v58 = vadd.f32 %v1756_v9, %v1814_v31  ;;  %v418_v9 = vadd.f32 %v1760_v16, %v1814_v31 }
 0x29f   :  { %v813_v10 = vmax.f32 %v747_v28, 0.0 }
 0x2a0   :  { %v812_v11 = vmax.f32 %v742_v41, 0.0  ;;  %851 = vadd.xlane.f32.xlu0 %v834_v3 }
 0x2a1   :  { %v836_v38 = vmul.f32 %v1823_v33, %v813_v10 }
 0x2a2   :  { %v835_v43 = vmul.f32 %v1823_v33, %v812_v11 }
 0x2a4   :  { %v1231_v42 = vpop.f32.mrb[36].mxu1  ;;  %853 = vadd.xlane.f32.xlu1 %v835_v43 }
 0x2a5   :  { %v757_v50 = vadd.f32 %v1231_v42, %v376_v25  ;;  %v751_v5 = vpop.f32.mrb[37].mxu1  ;;  %v424_v42 = vadd.f32 %v1764_v19, %v1814_v31  ;;  %v430_v19 = vadd.f32 %v1768_v22, %v1814_v31 }
 0x2a6   :  { %v752_v44 = vadd.f32 %v751_v5, %v370_v52 }
 0x2a7   :  { %v815_v45 = vmax.f32 %v757_v50, 0.0 }
 0x2a8   :  { %v814_v26 = vmax.f32 %v752_v44, 0.0  ;;  %855 = vadd.xlane.f32.xlu1 %v836_v38 }
 0x2a9   :  { %v838_v24 = vmul.f32 %v1823_v33, %v815_v45 }
 0x2aa   :  { %v837_v23 = vmul.f32 %v1823_v33, %v814_v26 }
 0x2ac   :  { %v1234_v53 = vpop.f32.mrb[38].mxu1  ;;  %859 = vadd.xlane.f32.xlu1 %v838_v24  ;;  %857 = vadd.xlane.f32.xlu0 %v837_v23  ;;  %v436_v23 = vadd.f32 %v1773_v27, %v1814_v31  ;;  %v1970_v31 = vlaneseq }
 0x2ad   :  { %v767_v20 = vadd.f32 %v1234_v53, %v388_v57  ;;  %v761_v18 = vpop.f32.mrb[39].mxu1 }
 0x2ae   :  { %v762_v39 = vadd.f32 %v761_v18, %v382_v55 }
 0x2af   :  { %v817_v34 = vmax.f32 %v767_v20, 0.0 }
 0x2b0   :  { %v816_v32 = vmax.f32 %v762_v39, 0.0 }
 0x2b1   :  { %v840_v29 = vmul.f32 %v1823_v33, %v817_v34 }
 0x2b2   :  { %v839_v48 = vmul.f32 %v1823_v33, %v816_v32  ;;  %v63_v32 = vsub.s32 3, %v1633_v12 }
 0x2b3   :  { %863 = vadd.xlane.f32.xlu1 %v840_v29  ;;  %v1876_v29 = vand.u32 127, %v1970_v31 }
 0x2b4   :  { %v1237_v60 = vpop.f32.mrb[40].mxu1  ;;  %861 = vadd.xlane.f32.xlu0 %v839_v48  ;;  %v1871_v27 = vrot.slane %v1642_v14, %v63_v32  ;;  %v915_v48 = vadd.s32 8, %v1633_v12  ;;  %v916_v14 = vadd.s32 16, %v1633_v12 }
 0x2b5   :  { %v777_v36 = vadd.f32 %v1237_v60, %v400_v35  ;;  %v771_v63 = vpop.f32.mrb[41].mxu1  ;;  %vm932_vm1 = vcmp.eq.s32.totalorder %v1633_v12, %v1876_v29 }
 0x2b6   :  { %v772_v37 = vadd.f32 %v771_v63, %v394_v62  ;;  %v348_v22 = vadd.f32 %v1714_v15, %v1871_v27  ;;  %vm933_vm2 = vcmp.eq.s32.totalorder %v915_v48, %v1876_v29  ;;  %v1971_v63 = vmov 0.0  }
 0x2b7   :  { %v819_v40 = vmax.f32 %v777_v36, 0.0  ;;  %vm934_vm3 = vcmp.eq.s32.totalorder %v916_v14, %v1876_v29 }
 0x2b8   :  { %v818_v47 = vmax.f32 %v772_v37, 0.0  ;;  %v1055_v37 = vsel %vm932_vm1, 1.0, %v1971_v63 }
 0x2b9   :  { %v842_v46 = vmul.f32 %v1823_v33, %v819_v40  ;;  %v1056_v40 = vsel %vm933_vm2, 1.0, %v1971_v63 }
 0x2ba   :  { %v841_v28 = vmul.f32 %v1823_v33, %v818_v47  ;;  %v360_v47 = vadd.f32 %v1722_v51, %v1871_v27  ;;  %v918_v51 = vadd.s32 32, %v1633_v12 }
 0x2bb   :  { %867 = vadd.xlane.f32.xlu1 %v842_v46 }
 0x2bc   :  { %v1240_v41 = vpop.f32.mrb[42].mxu1  ;;  %865 = vadd.xlane.f32.xlu0 %v841_v28  ;;  %vm936_vm5 = vcmp.eq.s32.totalorder %v918_v51, %v1876_v29  ;;  %v414_v51 = vadd.f32 %v1758_v13, %v1871_v27  ;;  %v926_v13 = vadd.s32 96, %v1633_v12 }
 0x2bd   :  { %v787_v1 = vadd.f32 %v1240_v41, %v412_v58  ;;  %v781_v3 = vpop.f32.mrb[43].mxu1 }
 0x2be   :  { %v782_v11 = vadd.f32 %v781_v3, %v406_v4  ;;  %v1057_v3 = vsel %vm934_vm3, 1.0, %v1971_v63  ;;  %vm944_vm13 = vcmp.eq.s32.totalorder %v926_v13, %v1876_v29 }
 0x2bf   :  { %v821_v10 = vmax.f32 %v787_v1, 0.0  ;;  %v366_v1 = vadd.f32 %v1726_v54, %v1871_v27  ;;  %v378_v54 = vadd.f32 %v1734_v59, %v1871_v27 }
 0x2c0   :  { %v820_v43 = vmax.f32 %v782_v11, 0.0 }
 0x2c1   :  { %v844_v25 = vmul.f32 %v1823_v33, %v821_v10 }
 0x2c2   :  { %v843_v52 = vmul.f32 %v1823_v33, %v820_v43 }
 0x2c3   :  { %871 = vadd.xlane.f32.xlu1 %v844_v25 }
 0x2c4   :  { %v1243_v50 = vpop.f32.mrb[44].mxu1  ;;  %869 = vadd.xlane.f32.xlu0 %v843_v52 }
 0x2c5   :  { %v797_v7 = vadd.f32 %v1243_v50, %v424_v42  ;;  %v791_v5 = vpop.f32.mrb[45].mxu1  ;;  %v919_v42 = vadd.s32 40, %v1633_v12 }
 0x2c6   :  { %v792_v44 = vadd.f32 %v791_v5, %v418_v9  ;;  %v372_v9 = vadd.f32 %v1730_v56, %v1871_v27 }
 0x2c7   :  { %v823_v38 = vmax.f32 %v797_v7, 0.0  ;;  %vm937_vm6 = vcmp.eq.s32.totalorder %v919_v42, %v1876_v29 }
 0x2c8   :  { %v822_v45 = vmax.f32 %v792_v44, 0.0  ;;  %v1060_v59 = vsel %vm937_vm6, 1.0, %v1971_v63 }
 0x2c9   :  { %v846_v26 = vmul.f32 %v1823_v33, %v823_v38 }
 0x2ca   :  { %v845_v24 = vmul.f32 %v1823_v33, %v822_v45 }
 0x2cb   :  { %875 = vadd.xlane.f32.xlu1 %v846_v26 }
 0x2cc   :  { %v1246_v57 = vpop.f32.mrb[46].mxu1  ;;  %873 = vadd.xlane.f32.xlu0 %v845_v24 }
 0x2cd   :  { %v807_v16 = vadd.f32 %v1246_v57, %v436_v23  ;;  %v801_v55 = vpop.f32.mrb[47].mxu1  ;;  %v1059_v23 = vsel %vm936_vm5, 1.0, %v1971_v63 }
 0x2ce   :  { %v802_v53 = vadd.f32 %v801_v55, %v430_v19 }
 0x2cf   :  { %v825_v20 = vmax.f32 %v807_v16, 0.0  ;;  %v920_v16 = vadd.s32 48, %v1633_v12 }
 0x2d0   :  { %v824_v18 = vmax.f32 %v802_v53, 0.0  ;;  %v921_v53 = vadd.s32 56, %v1633_v12 }
 0x2d1   :  { %v848_v39 = vmul.f32 %v1823_v33, %v825_v20  ;;  %v390_v20 = vadd.f32 %v1742_v0, %v1871_v27  ;;  %vm938_vm7 = vcmp.eq.s32.totalorder %v920_v16, %v1876_v29  ;;  %v922_v0 = vadd.s32 64, %v1633_v12 }
 0x2d2   :  { %v847_v34 = vmul.f32 %v1823_v33, %v824_v18  ;;  %v354_v33 = vadd.f32 %v1718_v49, %v1871_v27  ;;  %v917_v49 = vadd.s32 24, %v1633_v12  ;;  %v384_v18 = vadd.f32 %v1738_v61, %v1871_v27 }
 0x2d3   :  { %879 = vadd.xlane.f32.xlu1 %v848_v39  ;;  %vm939_vm8 = vcmp.eq.s32.totalorder %v921_v53, %v1876_v29  ;;  %vm940_vm9 = vcmp.eq.s32.totalorder %v922_v0, %v1876_v29 }
 0x2d4   :  { %877 = vadd.xlane.f32.xlu0 %v847_v34  ;;  %vm935_vm4 = vcmp.eq.s32.totalorder %v917_v49, %v1876_v29 }
 0x2d5   :  { %v1058_v50 = vsel %vm935_vm4, 1.0, %v1971_v63 }
 0x329   :  { %v850_v35 = vpop.xlane.xlu0 %849 }
 0x32a   :  { %v881_v62 = vadd.f32 %v850_v35, %v348_v22 }
 0x32c   :  { %v897_v36 = vmul.f32 %v881_v62, %v881_v62  ;;  %v1061_v62 = vsel %vm938_vm7, 1.0, %v1971_v63 }
 0x32d   :  { %v852_v60 = vpop.xlane.xlu0 %851 }
 0x32e   :  { %v882_v15 = vadd.f32 %v852_v60, %v354_v33  ;;  %v980_v58 = vmul.f32 %v1055_v37, %v897_v36  ;;  %v1062_v60 = vsel %vm939_vm8, 1.0, %v1971_v63  ;;  %v923_v36 = vadd.s32 72, %v1633_v12 }
 0x32f   :  { %v396_v37 = vadd.f32 %v1746_v2, %v1871_v27 }
 0x330   :  { %v898_v46 = vmul.f32 %v882_v15, %v882_v15  ;;  %v402_v15 = vadd.f32 %v1750_v6, %v1871_v27  ;;  %vm941_vm10 = vcmp.eq.s32.totalorder %v923_v36, %v1876_v29  ;;  %v924_v6 = vadd.s32 80, %v1633_v12 }
 0x331   :  { %v854_v28 = vpop.xlane.xlu1 %853 }
 0x332   :  { %v981_v4 = vmul.f32 %v1056_v40, %v898_v46  ;;  %v883_v41 = vadd.f32 %v854_v28, %v360_v47  ;;  %vm942_vm11 = vcmp.eq.s32.totalorder %v924_v6, %v1876_v29 }
 0x334   :  { %v996_v11 = vadd.f32 %v981_v4, %v980_v58  ;;  %v899_v10 = vmul.f32 %v883_v41, %v883_v41  ;;  %v1063_v41 = vsel %vm940_vm9, 1.0, %v1971_v63 }
 0x335   :  { %v856_v43 = vpop.xlane.xlu1 %855 }
 0x336   :  { %v982_v25 = vmul.f32 %v1057_v3, %v899_v10  ;;  %v884_v52 = vadd.f32 %v856_v43, %v366_v1  ;;  %v925_v10 = vadd.s32 88, %v1633_v12  ;;  %v408_v43 = vadd.f32 %v1754_v8, %v1871_v27 }
 0x338   :  { %v997_v7 = vadd.f32 %v996_v11, %v982_v25  ;;  %v900_v5 = vmul.f32 %v884_v52, %v884_v52  ;;  %v1064_v11 = vsel %vm941_vm10, 1.0, %v1971_v63  ;;  %vm943_vm12 = vcmp.eq.s32.totalorder %v925_v10, %v1876_v29 }
 0x339   :  { %v860_v44 = vpop.xlane.xlu1 %859  ;;  %v858_v38 = vpop.xlane.xlu0 %857 }
 0x33a   :  { %v983_v45 = vmul.f32 %v1058_v50, %v900_v5  ;;  %v886_v26 = vadd.f32 %v860_v44, %v378_v54  ;;  %v885_v24 = vadd.f32 %v858_v38, %v372_v9  ;;  %v1065_v5 = vsel %vm942_vm11, 1.0, %v1971_v63 }
 0x33c   :  { %v998_v19 = vadd.f32 %v997_v7, %v983_v45  ;;  %v902_v56 = vmul.f32 %v886_v26, %v886_v26  ;;  %v901_v57 = vmul.f32 %v885_v24, %v885_v24  ;;  %v1066_v45 = vsel %vm943_vm12, 1.0, %v1971_v63 }
 0x33d   :  { %v927_v26 = vadd.s32 104, %v1633_v12  ;;  %v426_v24 = vadd.f32 %v1766_v21, %v1871_v27  ;;  %v928_v21 = vadd.s32 112, %v1633_v12 }
 0x33e   :  { %v984_v55 = vmul.f32 %v1059_v23, %v901_v57  ;;  %v985_v39 = vmul.f32 %v1060_v59, %v902_v56  ;;  %v420_v23 = vadd.f32 %v1762_v17, %v1871_v27 }
 0x33f   :  { %vm945_vm14 = vcmp.eq.s32.totalorder %v927_v26, %v1876_v29  ;;  %vm946_vm15 = vcmp.eq.s32.totalorder %v928_v21, %v1876_v29 }
 0x340   :  { %v999_v34 = vadd.f32 %v998_v19, %v984_v55  ;;  %v864_v32 = vpop.xlane.xlu1 %863  ;;  %v1069_v36 = vsel %vm946_vm15, 1.0, %v1971_v63 }
 0x341   :  { %v888_v22 = vadd.f32 %v864_v32, %v390_v20  ;;  %v862_v31 = vpop.xlane.xlu0 %861  ;;  %v1067_v20 = vsel %vm944_vm13, 1.0, %v1971_v63  ;;  %v929_v32 = vadd.s32 120, %v1633_v12 }
 0x342   :  { %v1000_v48 = vadd.f32 %v999_v34, %v985_v39  ;;  %v887_v35 = vadd.f32 %v862_v31, %v384_v18  ;;  %v1068_v34 = vsel %vm945_vm14, 1.0, %v1971_v63  ;;  %v1972_v31 = vld [vmem:[#allocation2_spill] sm:$0xff] }
 0x343   :  { %v904_v33 = vmul.f32 %v888_v22, %v888_v22  ;;  %v438_v22 = vadd.f32 %v1778_v30, %v1871_v27  ;;  %vm947_vm0 = vcmp.eq.s32.totalorder %v929_v32, %v1876_v29 }
 0x344   :  { %v903_v14 = vmul.f32 %v887_v35, %v887_v35  ;;  %v1070_v30 = vsel %vm947_vm0, 1.0, %v1971_v63 }
 0x345   :  { %v987_v40 = vmul.f32 %v1062_v60, %v904_v33 }
 0x346   :  { %v986_v61 = vmul.f32 %v1061_v62, %v903_v14 }
 0x348   :  { %v1001_v47 = vadd.f32 %v1000_v48, %v986_v61  ;;  %v868_v46 = vpop.xlane.xlu1 %867  ;;  %v432_v48 = vadd.f32 %v1972_v31, %v1871_v27 }
 0x349   :  { %v890_v49 = vadd.f32 %v868_v46, %v402_v15  ;;  %v866_v28 = vpop.xlane.xlu0 %865 }
 0x34a   :  { %v1002_v58 = vadd.f32 %v1001_v47, %v987_v40  ;;  %v889_v4 = vadd.f32 %v866_v28, %v396_v37 }
 0x34b   :  { %v906_v1 = vmul.f32 %v890_v49, %v890_v49 }
 0x34c   :  { %v905_v3 = vmul.f32 %v889_v4, %v889_v4 }
 0x34d   :  { %v989_v25 = vmul.f32 %v1064_v11, %v906_v1 }
 0x34e   :  { %v988_v2 = vmul.f32 %v1063_v41, %v905_v3 }
 0x350   :  { %v1003_v52 = vadd.f32 %v1002_v58, %v988_v2  ;;  %v872_v42 = vpop.xlane.xlu1 %871 }
 0x351   :  { %v892_v9 = vadd.f32 %v872_v42, %v414_v51  ;;  %v870_v50 = vpop.xlane.xlu0 %869 }
 0x352   :  { %v1004_v54 = vadd.f32 %v1003_v52, %v989_v25  ;;  %v891_v7 = vadd.f32 %v870_v50, %v408_v43 }
 0x353   :  { %v908_v44 = vmul.f32 %v892_v9, %v892_v9 }
 0x354   :  { %v907_v38 = vmul.f32 %v891_v7, %v891_v7 }
 0x355   :  { %v991_v19 = vmul.f32 %v1066_v45, %v908_v44 }
 0x356   :  { %v990_v8 = vmul.f32 %v1065_v5, %v907_v38 }
 0x358   :  { %v1005_v56 = vadd.f32 %v1004_v54, %v990_v8  ;;  %v876_v57 = vpop.xlane.xlu1 %875 }
 0x359   :  { %v894_v16 = vadd.f32 %v876_v57, %v426_v24  ;;  %v874_v59 = vpop.xlane.xlu0 %873 }
 0x35a   :  { %v1006_v55 = vadd.f32 %v1005_v56, %v991_v19  ;;  %v893_v53 = vadd.f32 %v874_v59, %v420_v23 }
 0x35b   :  { %v910_v18 = vmul.f32 %v894_v16, %v894_v16 }
 0x35c   :  { %v909_v39 = vmul.f32 %v893_v53, %v893_v53 }
 0x35d   :  { %v993_v35 = vmul.f32 %v1068_v34, %v910_v18 }
 0x35e   :  { %v992_v17 = vmul.f32 %v1067_v20, %v909_v39 }
 0x360   :  { %v1007_v62 = vadd.f32 %v1006_v55, %v992_v17  ;;  %v880_v33 = vpop.xlane.xlu1 %879 }
 0x361   :  { %v896_v14 = vadd.f32 %v880_v33, %v438_v22  ;;  %v878_v0 = vpop.xlane.xlu0 %877 }
 0x362   :  { %v1008_v60 = vadd.f32 %v1007_v62, %v993_v35  ;;  %v895_v61 = vadd.f32 %v878_v0, %v432_v48 }
 0x363   :  { %v912_v12 = vmul.f32 %v896_v14, %v896_v14 }
 0x364   :  { %v911_v15 = vmul.f32 %v895_v61, %v895_v61 }
 0x365   :  { %v995_v40 = vmul.f32 %v1070_v30, %v912_v12 }
 0x366   :  { %v994_v37 = vmul.f32 %v1069_v36, %v911_v15 }
 0x368   :  { %v1009_v27 = vadd.f32 %v1008_v60, %v994_v37 }
 0x36a   :  { %v1010_v47 = vadd.f32 %v1009_v27, %v995_v40 }
 0x36c   :  { %v1011_v46 = vrot.slane %v1010_v47, 4 }
 0x36e   :  { %v1012_v49 = vadd.f32 %v1011_v46, %v1010_v47 }
 0x370   :  { %v1013_v28 = vrot.slane %v1012_v49, 2 }
 0x372   :  { %v1014_v58 = vadd.f32 %v1013_v28, %v1012_v49 }
 0x374   :  { %v1015_v4 = vrot.slane %v1014_v58, 1 }
 0x376   :  { %v1016_v41 = vadd.f32 %v1015_v4, %v1014_v58 }
 0x378   :  { %1017 = vst [vmem:[%s1965_s6] sm:$0x1] %v1016_v41 }

</bundles_post_ra>
